<compile_context>
chip_gen: v5e
topology: v5e:2x2
jax: 0.10.0
libtpu: 0.0.40
codegen_flags: <defaults>
</compile_context>

<pallas_src>
import functools

import jax
import jax.numpy as jnp
from jax.experimental import pallas as pl
from jax.experimental.pallas import tpu as pltpu


def _label_smoothing_kernel(pred_ref, tgt_ref, out_ref, *, eps, conf,
                            n_valid, tile_n, mask_rows):
    # pred_ref: (tile_n, C) float, tgt_ref: (tile_n, 1) int32, out_ref: (1, 1) f32
    i = pl.program_id(0)

    @pl.when(i == 0)
    def _():
        out_ref[...] = jnp.zeros_like(out_ref)

    x = pred_ref[...].astype(jnp.float32)                 # (tile_n, C)
    tn, c = x.shape

    # Numerically stable log-sum-exp per row.
    m = jnp.max(x, axis=-1, keepdims=True)                # (tile_n, 1)
    lse = jnp.log(jnp.sum(jnp.exp(x - m), axis=-1, keepdims=True)) + m

    # Row-wise pieces of the smoothed NLL without materializing logp.
    sum_x = jnp.sum(x, axis=-1, keepdims=True)            # (tile_n, 1)
    one_hot = jax.lax.broadcasted_iota(jnp.int32, (tn, c), 1) == tgt_ref[...]
    x_t = jnp.sum(jnp.where(one_hot, x, 0.0), axis=-1, keepdims=True)

    # -sum(true_dist * logp) per row; lse coefficient folds to exactly 1.
    per_row = lse - eps * sum_x - (conf - eps) * x_t      # (tile_n, 1)

    if mask_rows:
        # Rows of the partial last block that lie beyond the real batch.
        row_idx = i * tile_n + jax.lax.broadcasted_iota(jnp.int32, (tn, 1), 0)
        per_row = jnp.where(row_idx < n_valid, per_row, 0.0)

    # One scalar partial sum per tile, accumulated into the resident output.
    out_ref[...] += jnp.sum(per_row)


def _pick_tile_n(n, c, pred_dtype):
    """VMEM-budgeted row-tile size (multiple of the dtype sublane minimum)."""
    in_bytes = jnp.dtype(pred_dtype).itemsize
    sub = {1: 32, 2: 16, 4: 8}.get(in_bytes, 8)
    try:
        vmem_phys = int(pltpu.get_tpu_info().vmem_capacity_bytes)
    except Exception:
        vmem_phys = 64 * 1024 * 1024               # v7x floor (smallest VMEM)
    budget = vmem_phys // 4                        # working-set target w/ headroom
    # double-buffered pred DMA + in-kernel f32 temporaries + lane-padded target
    per_row_bytes = c * (2 * in_bytes + 16) + 2 * 128 * 4
    tile_n = max(sub, min(2048, budget // per_row_bytes))
    tile_n = (tile_n // sub) * sub
    n_up = ((n + sub - 1) // sub) * sub            # don't tile far past the batch
    tile_n = max(sub, min(tile_n, n_up))
    return int(tile_n), vmem_phys


def label_smoothing_loss(pred, target, *, classes, smoothing=0.0, tile_n=None):
    """Equivalent of LabelSmoothingLoss(classes, smoothing).forward(pred, target)."""
    n, c = pred.shape
    assert c == classes
    assert classes > 1, "smoothing / (classes - 1) requires classes > 1"

    if tile_n is None:
        tile_n, vmem_phys = _pick_tile_n(n, c, pred.dtype)
    else:
        tile_n = int(tile_n)
        try:
            vmem_phys = int(pltpu.get_tpu_info().vmem_capacity_bytes)
        except Exception:
            vmem_phys = 64 * 1024 * 1024

    num_tiles = int(pl.cdiv(n, tile_n))
    eps = float(smoothing) / (classes - 1)
    conf = 1.0 - float(smoothing)

    tgt2d = target.astype(jnp.int32).reshape(n, 1)

    kernel = functools.partial(
        _label_smoothing_kernel,
        eps=eps, conf=conf, n_valid=int(n), tile_n=int(tile_n),
        mask_rows=(n % tile_n != 0))

    total = pl.pallas_call(
        kernel,
        out_shape=jax.ShapeDtypeStruct((1, 1), jnp.float32),
        grid_spec=pltpu.PrefetchScalarGridSpec(
            num_scalar_prefetch=0,
            grid=(num_tiles,),
            in_specs=[
                pl.BlockSpec((tile_n, c), lambda i: (i, 0)),
                pl.BlockSpec((tile_n, 1), lambda i: (i, 0)),
            ],
            out_specs=pl.BlockSpec((1, 1), lambda i: (0, 0)),
        ),
        compiler_params=pltpu.CompilerParams(
            # output block accumulates across the grid -> axis must be arbitrary
            dimension_semantics=("arbitrary",),
            vmem_limit_bytes=int(vmem_phys // 2),
        ),
    )(pred, tgt2d)

    # torch.mean over the per-row sums.
    return total[0, 0] / n


def _reference(pred, target, *, classes, smoothing):
    # Pure-JAX reference replicating the PyTorch module exactly.
    logp = jax.nn.log_softmax(pred.astype(jnp.float32), axis=-1)
    eps = smoothing / (classes - 1)
    conf = 1.0 - smoothing
    true_dist = jnp.full_like(logp, eps)
    true_dist = true_dist.at[jnp.arange(pred.shape[0]), target].set(conf)
    return jnp.mean(jnp.sum(-true_dist * logp, axis=-1))


if __name__ == "__main__":
    key = jax.random.PRNGKey(0)

    # (N, C, smoothing): tile-aligned batch, ragged batch (partial last tile),
    # and smoothing=0 (plain cross-entropy) edge case.
    cases = [(8, 32, 0.1), (10, 32, 0.2), (8, 32, 0.0)]

    for N, C, smoothing in cases:
        key, k1, k2 = jax.random.split(key, 3)
        pred = jax.random.normal(k1, (N, C), dtype=jnp.float32)
        target = jax.random.randint(k2, (N,), 0, C, dtype=jnp.int32)

        loss = label_smoothing_loss(pred, target, classes=C, smoothing=smoothing)
        loss = jax.block_until_ready(loss)

        ref = _reference(pred, target, classes=C, smoothing=smoothing)
        assert jnp.allclose(loss, ref, rtol=1e-4, atol=1e-5), (N, C, smoothing, loss, ref)

    print("KERNEL_OK")
</pallas_src>

<mosaic_0001>
module attributes {stable_mosaic.version = 11 : i64} {
  func.func @_label_smoothing_kernel(%arg0: i32, %arg1: memref<8x32xf32, #tpu.memory_space<vmem>>, %arg2: memref<8x1xi32, #tpu.memory_space<vmem>>, %arg3: memref<1x1xf32, #tpu.memory_space<vmem>>) attributes {dimension_semantics = [#tpu.dimension_semantics<arbitrary>], iteration_bounds = array<i64: 1>, scalar_prefetch = 0 : i64, scratch_operands = 0 : i64, tpu.core_type = #tpu.core_type<tc>, window_params = [{transform_indices = @transform_0, window_bounds = array<i64: 8, 32>}, {transform_indices = @transform_1, window_bounds = array<i64: 8, 1>}, {pipeline_mode = #tpu.pipeline_mode<synchronous>, transform_indices = @transform_2, window_bounds = array<i64: 1, 1>}]} {
    %c0_i32 = arith.constant 0 : i32
    %0 = arith.cmpi eq, %arg0, %c0_i32 : i32
    %1 = arith.extui %0 : i1 to i32
    %c0_i32_0 = arith.constant 0 : i32
    %2 = arith.cmpi ne, %1, %c0_i32_0 : i32
    scf.if %2 {
      %cst_15 = arith.constant 0.000000e+00 : f32
      %37 = vector.broadcast %cst_15 : f32 to vector<1x1xf32>
      %c0_16 = arith.constant 0 : index
      %c0_17 = arith.constant 0 : index
      %38 = vector.load %arg3[%c0_16, %c0_17] : memref<1x1xf32, #tpu.memory_space<vmem>>, vector<1x1xf32>
      tpu.vector_store %arg3[%c0_16, %c0_17], %37 {strides = array<i32>} : memref<1x1xf32, #tpu.memory_space<vmem>>, vector<1x1xf32>,
    } else {
    }
    %c0 = arith.constant 0 : index
    %c0_1 = arith.constant 0 : index
    %3 = vector.load %arg1[%c0, %c0_1] : memref<8x32xf32, #tpu.memory_space<vmem>>, vector<8x32xf32>
    %cst = arith.constant dense<0xFF800000> : vector<8xf32>
    %4 = vector.multi_reduction <maximumf>, %3, %cst [1] : vector<8x32xf32> to vector<8xf32>
    %5 = vector.shape_cast %4 : vector<8xf32> to vector<8x1xf32>
    %6 = vector.broadcast %5 : vector<8x1xf32> to vector<8x32xf32>
    %7 = arith.subf %3, %6 : vector<8x32xf32>
    %8 = math.exp %7 : vector<8x32xf32>
    %cst_2 = arith.constant dense<0.000000e+00> : vector<8xf32>
    %9 = vector.multi_reduction <add>, %8, %cst_2 [1] : vector<8x32xf32> to vector<8xf32>
    %10 = vector.shape_cast %9 : vector<8xf32> to vector<8x1xf32>
    %11 = math.log %10 : vector<8x1xf32>
    %12 = arith.addf %11, %5 : vector<8x1xf32>
    %cst_3 = arith.constant dense<0.000000e+00> : vector<8xf32>
    %13 = vector.multi_reduction <add>, %3, %cst_3 [1] : vector<8x32xf32> to vector<8xf32>
    %14 = vector.shape_cast %13 : vector<8xf32> to vector<8x1xf32>
    %15 = tpu.iota {dimensions = array<i32: 1>} : vector<8x32xi32>
    %c0_4 = arith.constant 0 : index
    %c0_5 = arith.constant 0 : index
    %16 = vector.load %arg2[%c0_4, %c0_5] : memref<8x1xi32, #tpu.memory_space<vmem>>, vector<8x1xi32>
    %17 = vector.broadcast %16 : vector<8x1xi32> to vector<8x32xi32>
    %18 = arith.cmpi eq, %15, %17 : vector<8x32xi32>
    %cst_6 = arith.constant 0.000000e+00 : f32
    %19 = vector.broadcast %cst_6 : f32 to vector<8x32xf32>
    %20 = arith.select %18, %3, %19 : vector<8x32xi1>, vector<8x32xf32>
    %cst_7 = arith.constant dense<0.000000e+00> : vector<8xf32>
    %21 = vector.multi_reduction <add>, %20, %cst_7 [1] : vector<8x32xf32> to vector<8xf32>
    %22 = vector.shape_cast %21 : vector<8xf32> to vector<8x1xf32>
    %cst_8 = arith.constant 0.0032258064 : f32
    %23 = vector.broadcast %cst_8 : f32 to vector<8x1xf32>
    %24 = arith.mulf %23, %14 : vector<8x1xf32>
    %25 = arith.subf %12, %24 : vector<8x1xf32>
    %cst_9 = arith.constant 0.896774172 : f32
    %26 = vector.broadcast %cst_9 : f32 to vector<8x1xf32>
    %27 = arith.mulf %26, %22 : vector<8x1xf32>
    %28 = arith.subf %25, %27 : vector<8x1xf32>
    %c0_10 = arith.constant 0 : index
    %c0_11 = arith.constant 0 : index
    %29 = vector.load %arg3[%c0_10, %c0_11] : memref<1x1xf32, #tpu.memory_space<vmem>>, vector<1x1xf32>
    %30 = vector.shape_cast %28 : vector<8x1xf32> to vector<1x8x1xf32>
    %cst_12 = arith.constant dense<0.000000e+00> : vector<1xf32>
    %31 = vector.multi_reduction <add>, %30, %cst_12 [1, 2] : vector<1x8x1xf32> to vector<1xf32>
    %32 = vector.shape_cast %31 : vector<1xf32> to vector<1x1x1xf32>
    %33 = vector.extract %32[0, 0, 0] : f32 from vector<1x1x1xf32>
    %34 = vector.broadcast %33 : f32 to vector<1x1xf32>
    %35 = arith.addf %29, %34 : vector<1x1xf32>
    %c0_13 = arith.constant 0 : index
    %c0_14 = arith.constant 0 : index
    %36 = vector.load %arg3[%c0_13, %c0_14] : memref<1x1xf32, #tpu.memory_space<vmem>>, vector<1x1xf32>
    tpu.vector_store %arg3[%c0_13, %c0_14], %35 {strides = array<i32>} : memref<1x1xf32, #tpu.memory_space<vmem>>, vector<1x1xf32>,
    return
  }
  func.func @transform_0(%arg0: i32) -> (i32, i32) {
    %c0_i32 = arith.constant 0 : i32
    %c0_i32_0 = arith.constant 0 : i32
    return %arg0, %c0_i32 : i32, i32
  }
  func.func @transform_1(%arg0: i32) -> (i32, i32) {
    %c0_i32 = arith.constant 0 : i32
    %c0_i32_0 = arith.constant 0 : i32
    return %arg0, %c0_i32 : i32, i32
  }
  func.func @transform_2(%arg0: i32) -> (i32, i32) {
    %c0_i32 = arith.constant 0 : i32
    %c0_i32_0 = arith.constant 0 : i32
    %c0_i32_1 = arith.constant 0 : i32
    return %c0_i32, %c0_i32_0 : i32, i32
  }
}

</mosaic_0001>

<bundles_post_ra>
// kernel: tpu_custom_call.1
= control target key start
LH: loop header
LB: loop body
LE: loop exit
PB: predicated region body
PF: predicated region fallthrough
CT: control target
= control target key end

     0   :  { %vm19_vm0 = vcmask 261120   ;;  %s151_s0 = inlined_call_operand.vmem [shape: f32[8,32], index: 0, kind: input, shape index: {}]   ;;  %s152_s1 = inlined_call_operand.vmem [shape: s32[8,1], index: 1, kind: input, shape index: {}]   ;;  %s153_s2 = inlined_call_operand.hbm [shape: f32[1,1], index: 2, kind: output, shape index: {}]  }
   0x1   :  { %v18_v0 = vld [vmem:[%s151_s0] sm:$0xff] }
   0x2   :  { %7 = vsyncpa [#allocation3], 0  ;;  %v20_v1 = vsel %vm19_vm0, %v18_v0, -inf  ;;  %v118_v2 = vmov 0   ;;  %v37_v3 = vld [vmem:[%s152_s1] sm:$0xff]  ;;  %v35_v9 = vlaneseq  ;;  %v32_v11 = vsel %vm19_vm0, %v18_v0, 0.0 }
   0x3   :  { %87 = vset.pattern.permute.xlu0 %v118_v2  ;;  %vm51_vm2 = vcmask 7168   ;;  %vm16_vm3 = vcmask 0   ;;  %v119_v26 = vmov 0.0   ;;  %s120_s0 = smov [#allocation2]   ;;  %s73_s15 = sshll.u32 %s153_s2, 4  ;;  %s74_s15 = int_to_ptr.hbm [resolvable:$true] %s73_s15 }
   0x4   :  { %21 = vmax.xlane.f32.xlu0 %v20_v1  ;;  %v36_v10 = vand.u32 127, %v35_v9  ;;  %17 = vst.msk [vmem:[#allocation2] sm:$0x1] %vm16_vm3, %v119_v26  ;;  %s71_s1 = sshll.u32 %s120_s0, 4  ;;  %s72_s1 = int_to_ptr.vmem [resolvable:$true] %s71_s1 }
   0xb   :  { %v50_v34 = vld [vmem:[#allocation2] sm:$0x1] }
  0x18   :  { %39 = vperm.xlu0 %87, %v37_v3  }
  0x77   :  { %v22_v4 = vpop.xlane.xlu0 %21 }
  0x78   :  { %v23_v5 = vsub.f32 %v18_v0, %v22_v4 }
  0x7a   :  { %v24_v6 = vmul.f32 1.442695, %v23_v5 }
  0x7c   :  { %88 = vpow2.f32 %v24_v6 }
  0x82   :  { %v89_v7 = vpop.eup %88 }
  0x83   :  { %v26_v8 = vsel %vm19_vm0, %v89_v7, 0.0 }
  0x84   :  { %27 = vadd.xlane.f32.xlu1 %v26_v8 }
  0x8a   :  { %v40_v12 = vpop.permute.xlu0 %39 }
  0x8b   :  { %vm41_vm1 = vcmp.eq.s32.totalorder %v36_v10, %v40_v12 }
  0x8c   :  { %33 = vadd.xlane.f32.xlu1 %v32_v11  ;;  %v42_v13 = vsel %vm41_vm1, %v18_v0, 0.0 }
  0x8d   :  { %v43_v14 = vsel %vm19_vm0, %v42_v13, 0.0 }
  0x8e   :  { %44 = vadd.xlane.f32.xlu2 %v43_v14 }
  0xf7   :  { %v28_v15 = vpop.xlane.xlu1 %27 }
  0xf8   :  { %90 = vlog2.f32 %v28_v15 }
  0xfe   :  { %v91_v16 = vpop.eup %90 }
  0xff   :  { %v30_v17 = vmul.f32 0.6931472, %v91_v16  ;;  %v34_v18 = vpop.xlane.xlu1 %33 }
 0x100   :  { %v46_v19 = vmul.f32 0.0032258064, %v34_v18 }
 0x101   :  { %v31_v20 = vadd.f32 %v30_v17, %v22_v4  ;;  %v45_v21 = vpop.xlane.xlu2 %44 }
 0x102   :  { %v48_v22 = vmul.f32 0.8967742, %v45_v21 }
 0x103   :  { %v47_v23 = vsub.f32 %v31_v20, %v46_v19 }
 0x105   :  { %v49_v24 = vsub.f32 %v47_v23, %v48_v22 }
 0x107   :  { %v52_v25 = vsel %vm51_vm2, %v49_v24, 0.0 }
 0x108   :  { %53 = vadd.xlane.f32.xlu2 %v52_v25 }
 0x17b   :  { %v54_v27 = vpop.xlane.xlu2 %53 }
 0x17c   :  { %v55_v28 = vrot.slane %v54_v27, 4 }
 0x17e   :  { %v56_v29 = vadd.f32 %v55_v28, %v54_v27 }
 0x180   :  { %v57_v30 = vrot.slane %v56_v29, 2 }
 0x182   :  { %v58_v31 = vadd.f32 %v57_v30, %v56_v29 }
 0x184   :  { %v59_v32 = vrot.slane %v58_v31, 1 }
 0x186   :  { %v60_v33 = vadd.f32 %v59_v32, %v58_v31 }
 0x188   :  { %82 = vpush %v60_v33 }
 0x1b9   :  { %s83_s16 = spop %82 }
 0x1ba   :  { %v62_v35 = vstv %s83_s16 }
 0x1bb   :  { %v63_v36 = vadd.f32 %v62_v35, %v50_v34 }
 0x1bd   :  { %65 = vst.msk [vmem:[#allocation2] sm:$0x1] %vm16_vm3, %v63_v36 }
 0x1be   :  { %76 = dma.vmem_to_hbm [thread:$0]  %s72_s1, 16, %s74_s15, [#allocation3]  }
 0x1bf   :  { %116 = dma.done.wait [#allocation3], 16  }
 0x1c0   :  { %117 = vsyncadd [#allocation3], 4294967280 }
 0x1c1   :  { %81 = vsyncpa [#allocation3], 1 }

</bundles_post_ra>
